<compile_context>
chip_gen: v7x
topology: tpu7x:2x2x1
jax: 0.10.0
libtpu: 0.0.40
codegen_flags: <defaults>
</compile_context>

<pallas_src>
import jax
import jax.numpy as jnp
from jax.experimental import pallas as pl
from jax.experimental.pallas import tpu as pltpu


def _round_up(a, b):
    return (a + b - 1) // b * b


def _vmem_capacity_bytes():
    """Physical per-core VMEM; conservative 64 MiB (v7x) fallback."""
    try:
        cap = getattr(pltpu.get_tpu_info(), "vmem_capacity_bytes", None)
        if cap:
            return int(cap)
    except Exception:
        pass
    return 64 << 20


def _ffn_kernel(x_ref, w1_ref, b1_ref, w2_ref, b2_ref, o_ref):
    # x_ref:  (tm_p, Hp) packed/padded row tile (activation dtype)
    # w1_ref: (Hp, Hp)   block-diag / zero-padded conv1.weight[:, :, 0].T
    # b1_ref: (1, Hp)    tiled/padded bias (f32)
    # w2_ref: (Hp, Hp)   block-diag / zero-padded conv2.weight[:, :, 0].T
    # b2_ref: (1, Hp)
    x = x_ref[...]
    h = jnp.dot(x.astype(w1_ref.dtype), w1_ref[...],
                preferred_element_type=jnp.float32) + b1_ref[...]
    h = jnp.maximum(h, 0.0)  # ReLU
    # TODO(synk): dropout1/dropout2 are identity at inference; training-mode
    # dropout would use pltpu.prng_random_bits.
    y = jnp.dot(h.astype(w2_ref.dtype), w2_ref[...],
                preferred_element_type=jnp.float32)
    # Fused bias + residual in one VPU pass, all in f32.
    o_ref[...] = (y + b2_ref[...] + x.astype(jnp.float32)).astype(o_ref.dtype)


def prepare_pointwise_feedforward_params(w1, b1, w2, b2, *, x_dtype=jnp.float32,
                                         matmul_dtype=None):
    """One-time weight packing (hoist out of the per-call path; do at model init).

    w1, w2: (H, H) Conv1d weights (kernel dim squeezed, i.e. weight[:, :, 0],
            layout [out_channels, in_channels]); (H, H, 1) is also accepted.
    b1, b2: (H,) biases.
    """
    w1 = jnp.asarray(w1)
    w2 = jnp.asarray(w2)
    if w1.ndim == 3:
        w1 = w1[..., 0]
    if w2.ndim == 3:
        w2 = w2[..., 0]
    H = int(w1.shape[0])

    if H % 128 == 0:                    # already lane-aligned
        k, Hp = 1, H
    elif 128 % H == 0:                  # pack k logical rows per 128-wide row
        k, Hp = 128 // H, 128
    else:                               # awkward H: zero-pad channels to 128-mult
        k, Hp = 1, _round_up(H, 128)

    if matmul_dtype is None:
        # bf16 matmuls only where the kernel can be MXU-bound; the small-H
        # path is HBM-bound so it stays in the activation dtype.
        matmul_dtype = (jnp.bfloat16
                        if (Hp >= 512 and jnp.dtype(x_dtype) == jnp.float32)
                        else x_dtype)

    w1t = w1.T.astype(matmul_dtype)     # (in, out): x @ w1t == x @ W1.T
    w2t = w2.T.astype(matmul_dtype)
    b1v = jnp.asarray(b1).astype(jnp.float32)
    b2v = jnp.asarray(b2).astype(jnp.float32)

    if k > 1:
        # block_diag of k copies of W.T: [i*H+a, j*H+b] = delta_ij * Wt[a, b]
        eye = jnp.eye(k, dtype=matmul_dtype)
        w1p = jnp.einsum("ij,ab->iajb", eye, w1t).reshape(Hp, Hp)
        w2p = jnp.einsum("ij,ab->iajb", eye, w2t).reshape(Hp, Hp)
        b1p = jnp.tile(b1v, k).reshape(1, Hp)
        b2p = jnp.tile(b2v, k).reshape(1, Hp)
    elif Hp != H:
        pad = Hp - H
        w1p = jnp.pad(w1t, ((0, pad), (0, pad)))
        w2p = jnp.pad(w2t, ((0, pad), (0, pad)))
        b1p = jnp.pad(b1v, (0, pad)).reshape(1, Hp)
        b2p = jnp.pad(b2v, (0, pad)).reshape(1, Hp)
    else:
        w1p, w2p = w1t, w2t
        b1p, b2p = b1v.reshape(1, Hp), b2v.reshape(1, Hp)

    return dict(w1=w1p, b1=b1p, w2=w2p, b2=b2p, H=H, k=k, Hp=Hp)


def pointwise_feedforward(x, params, *, tm_p=None):
    """x: (B, L, H). params: from prepare_pointwise_feedforward_params."""
    B, L, H = x.shape
    assert H == params["H"]
    k, Hp = params["k"], params["Hp"]
    dtype = x.dtype
    itemsize = jnp.dtype(dtype).itemsize
    w_itemsize = jnp.dtype(params["w1"].dtype).itemsize
    rows = B * L

    x2d = x.reshape(rows, H)
    if k == 1 and Hp != H:
        # Awkward-H fallback: zero-pad channels so loads/stores stay lane-dense.
        x2d = jnp.pad(x2d, ((0, 0), (0, Hp - H)))
    rows_k = _round_up(rows, k)
    if rows_k != rows:
        # At most k-1 pad rows; skipped entirely whenever rows % k == 0.
        x2d = jnp.pad(x2d, ((0, rows_k - rows), (0, 0)))
    packed_rows = rows_k // k
    xp = x2d.reshape(packed_rows, Hp)          # free row-major reshape

    # ---- row-tile sizing against the real VMEM footprint -------------------
    vmem_cap = _vmem_capacity_bytes()
    if tm_p is None:
        # ~1 MiB per activation block (tm_p = 2048 packed rows at Hp=128/f32):
        # per-step in+out DMA comfortably exceeds the ~0.35us step overhead.
        tm_p = max((1 << 20) // (Hp * itemsize), 256)
    tm_p = max(8, (tm_p // 8) * 8)

    def footprint(t):
        io = 2 * 2 * (t * Hp * itemsize)               # in + out, double-buffered
        interm = 2 * t * Hp * 4                        # f32 intermediates h, y
        weights = 2 * Hp * Hp * w_itemsize + 2 * Hp * 4  # single-buffered residents
        return io + interm + weights

    budget = int(0.75 * vmem_cap)
    while footprint(tm_p) > budget and tm_p > 64:
        tm_p = max(8, (tm_p // 2 // 8) * 8)
    # TODO(synk): if the two (Hp, Hp) resident weights alone blow the budget
    # (H ~ 1-2K on v7x), K/N-tile them with a 3-axis grid + f32 accumulator
    # instead of shrinking the row tile further.
    if tm_p >= packed_rows:
        tm_p = packed_rows          # single full-extent block (any size allowed)
    grid = pl.cdiv(packed_rows, tm_p)   # ragged last tile handled by Pallas

    vmem_limit = int(min(max(footprint(tm_p) + (4 << 20), 32 << 20),
                         int(vmem_cap * 0.85)))

    cost = pl.CostEstimate(
        flops=4 * rows * H * H,     # useful FLOPs (2 matmuls), excl. block-diag waste
        transcendentals=0,
        bytes_accessed=2 * rows * H * itemsize + 2 * Hp * Hp * w_itemsize,
    )

    def run(single_buffer_weights):
        if single_buffer_weights:
            def const_spec(shape):
                return pl.BlockSpec(shape, lambda i: (0, 0),
                                    pipeline_mode=pl.Buffered(1))
        else:
            def const_spec(shape):
                return pl.BlockSpec(shape, lambda i: (0, 0))
        return pl.pallas_call(
            _ffn_kernel,
            out_shape=jax.ShapeDtypeStruct((packed_rows, Hp), dtype),
            grid_spec=pltpu.PrefetchScalarGridSpec(
                num_scalar_prefetch=0,
                grid=(grid,),
                in_specs=[
                    pl.BlockSpec((tm_p, Hp), lambda i: (i, 0)),   # x row tile
                    const_spec((Hp, Hp)),                         # W1 (resident)
                    const_spec((1, Hp)),                          # b1 (resident)
                    const_spec((Hp, Hp)),                         # W2 (resident)
                    const_spec((1, Hp)),                          # b2 (resident)
                ],
                out_specs=pl.BlockSpec((tm_p, Hp), lambda i: (i, 0)),
            ),
            compiler_params=pltpu.CompilerParams(
                dimension_semantics=("parallel",),
                vmem_limit_bytes=vmem_limit,
            ),
            cost_estimate=cost,
        )(xp, params["w1"], params["b1"], params["w2"], params["b2"])

    try:
        # Constant-index residents only need one buffer (halves weight VMEM).
        out_p = run(single_buffer_weights=True)
    except Exception:
        # pipeline_mode=pl.Buffered(1) unsupported on this jax version: fall
        # back to default double-buffering (correct, just uses more VMEM).
        out_p = run(single_buffer_weights=False)

    if k > 1:
        out2d = out_p.reshape(rows_k, H)
        if rows_k != rows:
            out2d = out2d[:rows]
    elif Hp != H:
        out2d = out_p[:, :H]
    else:
        out2d = out_p
    return out2d.reshape(B, L, H)


def reference(x, w1, b1, w2, b2):
    h = jnp.maximum(jnp.einsum("blh,oh->blo", x, w1) + b1, 0.0)
    y = jnp.einsum("blh,oh->blo", h, w2) + b2
    return y + x


if __name__ == "__main__":
    B, L, H = 2, 8, 32  # batch, seq, hidden_units
    key = jax.random.PRNGKey(0)
    kx, k1, k2, k3, k4 = jax.random.split(key, 5)

    x = jax.random.normal(kx, (B, L, H), dtype=jnp.float32)
    # Conv1d(hidden, hidden, kernel_size=1) weights: (out, in, 1) -> squeeze to (out, in)
    bound = 1.0 / (H ** 0.5)
    w1 = jax.random.uniform(k1, (H, H), jnp.float32, -bound, bound)
    b1 = jax.random.uniform(k2, (H,), jnp.float32, -bound, bound)
    w2 = jax.random.uniform(k3, (H, H), jnp.float32, -bound, bound)
    b2 = jax.random.uniform(k4, (H,), jnp.float32, -bound, bound)

    # Hoisted one-time weight packing (would live at model init in production).
    params = prepare_pointwise_feedforward_params(w1, b1, w2, b2, x_dtype=x.dtype)

    out = pointwise_feedforward(x, params)
    out = jax.block_until_ready(out)

    ref = reference(x, w1, b1, w2, b2)
    assert out.shape == (B, L, H)
    assert jnp.allclose(out, ref, atol=1e-5, rtol=1e-5), "mismatch vs reference"
    print("KERNEL_OK")
</pallas_src>

<mosaic_0001>
module attributes {stable_mosaic.version = 11 : i64} {
  func.func @_ffn_kernel(%arg0: i32, %arg1: memref<4x128xf32, #tpu.memory_space<vmem>>, %arg2: memref<128x128xf32, #tpu.memory_space<vmem>>, %arg3: memref<1x128xf32, #tpu.memory_space<vmem>>, %arg4: memref<128x128xf32, #tpu.memory_space<vmem>>, %arg5: memref<1x128xf32, #tpu.memory_space<vmem>>, %arg6: memref<4x128xf32, #tpu.memory_space<vmem>>) attributes {dimension_semantics = [#tpu.dimension_semantics<parallel>], iteration_bounds = array<i64: 1>, scalar_prefetch = 0 : i64, scratch_operands = 0 : i64, tpu.core_type = #tpu.core_type<tc>, window_params = [{transform_indices = @transform_0, window_bounds = array<i64: 4, 128>}, {pipeline_mode = #tpu.pipeline_mode<synchronous>, transform_indices = @transform_1, window_bounds = array<i64: 128, 128>}, {pipeline_mode = #tpu.pipeline_mode<synchronous>, transform_indices = @transform_2, window_bounds = array<i64: 1, 128>}, {pipeline_mode = #tpu.pipeline_mode<synchronous>, transform_indices = @transform_3, window_bounds = array<i64: 128, 128>}, {pipeline_mode = #tpu.pipeline_mode<synchronous>, transform_indices = @transform_4, window_bounds = array<i64: 1, 128>}, {transform_indices = @transform_5, window_bounds = array<i64: 4, 128>}]} {
    %c0 = arith.constant 0 : index
    %c0_0 = arith.constant 0 : index
    %0 = vector.load %arg1[%c0, %c0_0] : memref<4x128xf32, #tpu.memory_space<vmem>>, vector<4x128xf32>
    %c0_1 = arith.constant 0 : index
    %c0_2 = arith.constant 0 : index
    %1 = vector.load %arg2[%c0_1, %c0_2] : memref<128x128xf32, #tpu.memory_space<vmem>>, vector<128x128xf32>
    %cst = arith.constant dense<0.000000e+00> : vector<4x128xf32>
    %2 = tpu.matmul %0, %1, %cst {dimension_numbers = #tpu.dot_dimension_numbers<[1], [0], [0], [1], [0, 0, 1, 1], [], []>} : vector<4x128xf32>, vector<128x128xf32>, vector<4x128xf32> -> vector<4x128xf32>
    %c0_3 = arith.constant 0 : index
    %c0_4 = arith.constant 0 : index
    %3 = vector.load %arg3[%c0_3, %c0_4] : memref<1x128xf32, #tpu.memory_space<vmem>>, vector<1x128xf32>
    %4 = vector.broadcast %3 : vector<1x128xf32> to vector<4x128xf32>
    %5 = arith.addf %2, %4 : vector<4x128xf32>
    %cst_5 = arith.constant 0.000000e+00 : f32
    %6 = vector.broadcast %cst_5 : f32 to vector<4x128xf32>
    %7 = arith.maximumf %5, %6 : vector<4x128xf32>
    %c0_6 = arith.constant 0 : index
    %c0_7 = arith.constant 0 : index
    %8 = vector.load %arg4[%c0_6, %c0_7] : memref<128x128xf32, #tpu.memory_space<vmem>>, vector<128x128xf32>
    %cst_8 = arith.constant dense<0.000000e+00> : vector<4x128xf32>
    %9 = tpu.matmul %7, %8, %cst_8 {dimension_numbers = #tpu.dot_dimension_numbers<[1], [0], [0], [1], [0, 0, 1, 1], [], []>} : vector<4x128xf32>, vector<128x128xf32>, vector<4x128xf32> -> vector<4x128xf32>
    %c0_9 = arith.constant 0 : index
    %c0_10 = arith.constant 0 : index
    %10 = vector.load %arg5[%c0_9, %c0_10] : memref<1x128xf32, #tpu.memory_space<vmem>>, vector<1x128xf32>
    %11 = vector.broadcast %10 : vector<1x128xf32> to vector<4x128xf32>
    %12 = arith.addf %9, %11 : vector<4x128xf32>
    %13 = arith.addf %12, %0 : vector<4x128xf32>
    %c0_11 = arith.constant 0 : index
    %c0_12 = arith.constant 0 : index
    %14 = vector.load %arg6[%c0_11, %c0_12] : memref<4x128xf32, #tpu.memory_space<vmem>>, vector<4x128xf32>
    tpu.vector_store %arg6[%c0_11, %c0_12], %13 {strides = array<i32>} : memref<4x128xf32, #tpu.memory_space<vmem>>, vector<4x128xf32>,
    return
  }
  func.func @transform_0(%arg0: i32) -> (i32, i32) {
    %c0_i32 = arith.constant 0 : i32
    %c0_i32_0 = arith.constant 0 : i32
    return %arg0, %c0_i32 : i32, i32
  }
  func.func @transform_1(%arg0: i32) -> (i32, i32) {
    %c0_i32 = arith.constant 0 : i32
    %c0_i32_0 = arith.constant 0 : i32
    %c0_i32_1 = arith.constant 0 : i32
    return %c0_i32, %c0_i32_0 : i32, i32
  }
  func.func @transform_2(%arg0: i32) -> (i32, i32) {
    %c0_i32 = arith.constant 0 : i32
    %c0_i32_0 = arith.constant 0 : i32
    %c0_i32_1 = arith.constant 0 : i32
    return %c0_i32, %c0_i32_0 : i32, i32
  }
  func.func @transform_3(%arg0: i32) -> (i32, i32) {
    %c0_i32 = arith.constant 0 : i32
    %c0_i32_0 = arith.constant 0 : i32
    %c0_i32_1 = arith.constant 0 : i32
    return %c0_i32, %c0_i32_0 : i32, i32
  }
  func.func @transform_4(%arg0: i32) -> (i32, i32) {
    %c0_i32 = arith.constant 0 : i32
    %c0_i32_0 = arith.constant 0 : i32
    %c0_i32_1 = arith.constant 0 : i32
    return %c0_i32, %c0_i32_0 : i32, i32
  }
  func.func @transform_5(%arg0: i32) -> (i32, i32) {
    %c0_i32 = arith.constant 0 : i32
    %c0_i32_0 = arith.constant 0 : i32
    return %arg0, %c0_i32 : i32, i32
  }
}

module attributes {stable_mosaic.version = 11 : i64} {
  func.func @_ffn_kernel(%arg0: i32, %arg1: memref<4x128xf32, #tpu.memory_space<vmem>>, %arg2: memref<128x128xf32, #tpu.memory_space<vmem>>, %arg3: memref<1x128xf32, #tpu.memory_space<vmem>>, %arg4: memref<128x128xf32, #tpu.memory_space<vmem>>, %arg5: memref<1x128xf32, #tpu.memory_space<vmem>>, %arg6: memref<4x128xf32, #tpu.memory_space<vmem>>) attributes {dimension_semantics = [#tpu.dimension_semantics<parallel>], iteration_bounds = array<i64: 1>, scalar_prefetch = 0 : i64, scratch_operands = 0 : i64, tpu.core_type = #tpu.core_type<tc>, window_params = [{transform_indices = @transform_0, window_bounds = array<i64: 4, 128>}, {pipeline_mode = #tpu.pipeline_mode<synchronous>, transform_indices = @transform_1, window_bounds = array<i64: 128, 128>}, {pipeline_mode = #tpu.pipeline_mode<synchronous>, transform_indices = @transform_2, window_bounds = array<i64: 1, 128>}, {pipeline_mode = #tpu.pipeline_mode<synchronous>, transform_indices = @transform_3, window_bounds = array<i64: 128, 128>}, {pipeline_mode = #tpu.pipeline_mode<synchronous>, transform_indices = @transform_4, window_bounds = array<i64: 1, 128>}, {transform_indices = @transform_5, window_bounds = array<i64: 4, 128>}]} {
    %c0 = arith.constant 0 : index
    %c0_0 = arith.constant 0 : index
    %0 = vector.load %arg1[%c0, %c0_0] : memref<4x128xf32, #tpu.memory_space<vmem>>, vector<4x128xf32>
    %c0_1 = arith.constant 0 : index
    %c0_2 = arith.constant 0 : index
    %1 = vector.load %arg2[%c0_1, %c0_2] : memref<128x128xf32, #tpu.memory_space<vmem>>, vector<128x128xf32>
    %cst = arith.constant dense<0.000000e+00> : vector<4x128xf32>
    %2 = tpu.matmul %0, %1, %cst {dimension_numbers = #tpu.dot_dimension_numbers<[1], [0], [0], [1], [0, 0, 1, 1], [], []>} : vector<4x128xf32>, vector<128x128xf32>, vector<4x128xf32> -> vector<4x128xf32>
    %c0_3 = arith.constant 0 : index
    %c0_4 = arith.constant 0 : index
    %3 = vector.load %arg3[%c0_3, %c0_4] : memref<1x128xf32, #tpu.memory_space<vmem>>, vector<1x128xf32>
    %4 = vector.broadcast %3 : vector<1x128xf32> to vector<4x128xf32>
    %5 = arith.addf %2, %4 : vector<4x128xf32>
    %cst_5 = arith.constant 0.000000e+00 : f32
    %6 = vector.broadcast %cst_5 : f32 to vector<4x128xf32>
    %7 = arith.maximumf %5, %6 : vector<4x128xf32>
    %c0_6 = arith.constant 0 : index
    %c0_7 = arith.constant 0 : index
    %8 = vector.load %arg4[%c0_6, %c0_7] : memref<128x128xf32, #tpu.memory_space<vmem>>, vector<128x128xf32>
    %cst_8 = arith.constant dense<0.000000e+00> : vector<4x128xf32>
    %9 = tpu.matmul %7, %8, %cst_8 {dimension_numbers = #tpu.dot_dimension_numbers<[1], [0], [0], [1], [0, 0, 1, 1], [], []>} : vector<4x128xf32>, vector<128x128xf32>, vector<4x128xf32> -> vector<4x128xf32>
    %c0_9 = arith.constant 0 : index
    %c0_10 = arith.constant 0 : index
    %10 = vector.load %arg5[%c0_9, %c0_10] : memref<1x128xf32, #tpu.memory_space<vmem>>, vector<1x128xf32>
    %11 = vector.broadcast %10 : vector<1x128xf32> to vector<4x128xf32>
    %12 = arith.addf %9, %11 : vector<4x128xf32>
    %13 = arith.addf %12, %0 : vector<4x128xf32>
    %c0_11 = arith.constant 0 : index
    %c0_12 = arith.constant 0 : index
    %14 = vector.load %arg6[%c0_11, %c0_12] : memref<4x128xf32, #tpu.memory_space<vmem>>, vector<4x128xf32>
    tpu.vector_store %arg6[%c0_11, %c0_12], %13 {strides = array<i32>} : memref<4x128xf32, #tpu.memory_space<vmem>>, vector<4x128xf32>,
    return
  }
  func.func @transform_0(%arg0: i32) -> (i32, i32) {
    %c0_i32 = arith.constant 0 : i32
    %c0_i32_0 = arith.constant 0 : i32
    return %arg0, %c0_i32 : i32, i32
  }
  func.func @transform_1(%arg0: i32) -> (i32, i32) {
    %c0_i32 = arith.constant 0 : i32
    %c0_i32_0 = arith.constant 0 : i32
    %c0_i32_1 = arith.constant 0 : i32
    return %c0_i32, %c0_i32_0 : i32, i32
  }
  func.func @transform_2(%arg0: i32) -> (i32, i32) {
    %c0_i32 = arith.constant 0 : i32
    %c0_i32_0 = arith.constant 0 : i32
    %c0_i32_1 = arith.constant 0 : i32
    return %c0_i32, %c0_i32_0 : i32, i32
  }
  func.func @transform_3(%arg0: i32) -> (i32, i32) {
    %c0_i32 = arith.constant 0 : i32
    %c0_i32_0 = arith.constant 0 : i32
    %c0_i32_1 = arith.constant 0 : i32
    return %c0_i32, %c0_i32_0 : i32, i32
  }
  func.func @transform_4(%arg0: i32) -> (i32, i32) {
    %c0_i32 = arith.constant 0 : i32
    %c0_i32_0 = arith.constant 0 : i32
    %c0_i32_1 = arith.constant 0 : i32
    return %c0_i32, %c0_i32_0 : i32, i32
  }
  func.func @transform_5(%arg0: i32) -> (i32, i32) {
    %c0_i32 = arith.constant 0 : i32
    %c0_i32_0 = arith.constant 0 : i32
    return %arg0, %c0_i32 : i32, i32
  }
}

</mosaic_0001>

<bundles_post_ra>
// kernel: tpu_custom_call.1
= control target key start
LH: loop header
LB: loop body
LE: loop exit
PB: predicated region body
PF: predicated region fallthrough
CT: control target
= control target key end

     0   :  { %10 = vsyncpa [#allocation3], 0  ;;  %s638_s0 = inlined_call_operand.hbm [shape: f32[4,128], index: 0, kind: input, shape index: {}]   ;;  %s639_s1 = inlined_call_operand.hbm [shape: f32[128,128], index: 1, kind: input, shape index: {}]   ;;  %s640_s2 = inlined_call_operand.vmem [shape: f32[1,128], index: 2, kind: input, shape index: {}]   ;;  %s641_s3 = inlined_call_operand.hbm [shape: f32[128,128], index: 3, kind: input, shape index: {}]   ;;  %s642_s4 = inlined_call_operand.vmem [shape: f32[1,128], index: 4, kind: input, shape index: {}]   ;;  %s643_s5 = inlined_call_operand.hbm [shape: f32[4,128], index: 5, kind: output, shape index: {}]  }
   0x1   :  { %11 = vsyncpa [#allocation6], 0 }
   0x2   :  { %12 = vsyncpa [#allocation4], 0  ;;  %s523_s18 = smov [#allocation5]   ;;  %s429_s22 = scalar_lea.hbm %s639_s1, 2048 }
   0x3   :  { %s28_s19 = sshll.u32 %s523_s18, 4  ;;  %p430_p0 = scmp.ne.s32.totalorder %s639_s1, %s429_s22  ;;  %s29_s19 = int_to_ptr.vmem [resolvable:$true] %s28_s19 }
   0x4   :  { %p433_p1 = scmp.lt.u32.totalorder %s429_s22, %s639_s1 }
   0x6   :  { %p435_p2 = pnand %p433_p1, %p430_p0 }
   0x8   :  { %438 = shalt.err (!%p435_p2)
}
   0x9   :  { %s439_s27 = scalar_lea.vmem %s29_s19, 2048  ;;  %p444_p4 = scmp.lt.s32.totalorder %s29_s19, %s29_s19 }
   0xa   :  { %p440_p3 = scmp.ne.s32.totalorder %s29_s19, %s439_s27  ;;  %p445_p5 = scmp.lt.s32.totalorder %s439_s27, %s439_s27 }
   0xc   :  { %p446_p6 = por %p445_p5, %p444_p4 }
   0xe   :  { %p447_p7 = pnand %p446_p6, %p440_p3 }
  0x10   :  { %450 = shalt.err (!%p447_p7)
}
  0x11   :  { %s524_s28 = smov 128   ;;  %s525_s29 = smov 8  }
  0x12   :  { %34 = dma.hbm_to_vmem [thread:$0]  %s639_s1, 2048, %s29_s19, [#allocation6], %s524_s28, %s524_s28, %s525_s29  }
  0x13   :  { %s526_s7 = smov [#allocation2]   ;;  %s527_s9 = smov [#allocation7]  }
  0x14   :  { %s19_s8 = sshll.u32 %s526_s7, 4  ;;  %s42_s10 = sshll.u32 %s527_s9, 4  ;;  %s20_s8 = int_to_ptr.vmem [resolvable:$true] %s19_s8  ;;  %s43_s10 = int_to_ptr.vmem [resolvable:$true] %s42_s10 }
  0x15   :  { %s451_s13 = scalar_lea.hbm %s638_s0, 64 }
  0x16   :  { %p452_p8 = scmp.ne.s32.totalorder %s638_s0, %s451_s13  ;;  %p455_p9 = scmp.lt.u32.totalorder %s451_s13, %s638_s0 }
  0x18   :  { %p457_p10 = pnand %p455_p9, %p452_p8 }
  0x1a   :  { %460 = shalt.err (!%p457_p10)
}
  0x1b   :  { %s461_s1 = scalar_lea.vmem %s20_s8, 64  ;;  %p466_p12 = scmp.lt.s32.totalorder %s20_s8, %s20_s8 }
  0x1c   :  { %p462_p11 = scmp.ne.s32.totalorder %s20_s8, %s461_s1  ;;  %p467_p13 = scmp.lt.s32.totalorder %s461_s1, %s461_s1 }
  0x1e   :  { %p468_p0 = por %p467_p13, %p466_p12 }
  0x20   :  { %p469_p1 = pnand %p468_p0, %p462_p11 }
  0x22   :  { %472 = shalt.err (!%p469_p1)
}
  0x23   :  { %22 = dma.hbm_to_vmem [thread:$0]  %s638_s0, 64, %s20_s8, [#allocation3]  }
  0x24   :  { %s473_s22 = scalar_lea.hbm %s641_s3, 2048 }
  0x25   :  { %p474_p2 = scmp.ne.s32.totalorder %s641_s3, %s473_s22  ;;  %p477_p3 = scmp.lt.u32.totalorder %s473_s22, %s641_s3 }
  0x27   :  { %p479_p4 = pnand %p477_p3, %p474_p2 }
  0x29   :  { %482 = shalt.err (!%p479_p4)
}
  0x2a   :  { %s483_s27 = scalar_lea.vmem %s43_s10, 2048  ;;  %p488_p6 = scmp.lt.s32.totalorder %s43_s10, %s43_s10 }
  0x2b   :  { %p484_p5 = scmp.ne.s32.totalorder %s43_s10, %s483_s27  ;;  %p489_p7 = scmp.lt.s32.totalorder %s483_s27, %s483_s27 }
  0x2d   :  { %p490_p8 = por %p489_p7, %p488_p6 }
  0x2f   :  { %p491_p9 = pnand %p490_p8, %p484_p5 }
  0x31   :  { %494 = shalt.err (!%p491_p9)
}
  0x32   :  { %48 = dma.hbm_to_vmem [thread:$0]  %s641_s3, 2048, %s43_s10, [#allocation6], %s524_s28, %s524_s28, %s525_s29  }
  0x33   :  { %517 = dma.done.wait [#allocation3], 64  }
  0x34   :  { %518 = vsyncadd [#allocation3], 4294967232 }
  0x35   :  { %519 = dma.done.wait [#allocation6], 4096  }
  0x36   :  { %520 = vsyncadd [#allocation6], 4294963200  ;;  %v528_v0 = vmov 0.0|0.0   ;;  %vm529_vm0 = vmmov 0   ;;  %v530_v1 = vmov 0.0   ;;  %v61_v2 = vld [vmem:[#allocation5] sm:$0xff] }
  0x37   :  { %372 = vmatprep.subr.bf16.mxu0 %v528_v0  ;;  %334 = vmatprep.mubr.msk.f32.mxu0 %vm529_vm0, %v530_v1  ;;  %v62_v3 = vld [vmem:[#allocation5 + $0x8] sm:$0xff]  ;;  %v63_v4 = vld [vmem:[#allocation5 + $0x10] sm:$0xff]  ;;  %v64_v6 = vld [vmem:[#allocation5 + $0x18] sm:$0xff]  ;;  %s531_s7 = smov [#allocation8]  }
  0x38   :  { %396 = vmatprep.subr.bf16.mxu1 %v528_v0  ;;  %369 = vmatprep.mubr.msk.f32.mxu1 %vm529_vm0, %v530_v1  ;;  %v373_v5 = vpack.c.bf16 %v62_v3, %v61_v2  ;;  %v376_v7 = vpack.c.bf16 %v64_v6, %v63_v4  ;;  %v65_v8 = vld [vmem:[#allocation5 + $0x20] sm:$0xff]  ;;  %v66_v9 = vld [vmem:[#allocation5 + $0x28] sm:$0xff]  ;;  %v157_v12 = vld [vmem:[#allocation7 + $0x10] sm:$0xff]  ;;  %s256_s8 = sshll.u32 %s531_s7, 4  ;;  %s257_s8 = int_to_ptr.vmem [resolvable:$true] %s256_s8 }
  0x39   :  { %v155_v10 = vld [vmem:[#allocation7] sm:$0xff]  ;;  %v156_v11 = vld [vmem:[#allocation7 + $0x8] sm:$0xff]  ;;  %v158_v13 = vld [vmem:[#allocation7 + $0x18] sm:$0xff]  ;;  %v379_v14 = vpack.c.bf16 %v66_v9, %v65_v8  ;;  %s495_s9 = scalar_lea.vmem %s257_s8, 64  ;;  %p500_p11 = scmp.lt.s32.totalorder %s257_s8, %s257_s8 }
  0x3a   :  { %374 = vmatpush3.bf16.msra.mxu0 %v373_v5  ;;  %v397_v15 = vpack.c.bf16 %v156_v11, %v155_v10  ;;  %v67_v16 = vld [vmem:[#allocation5 + $0x30] sm:$0xff]  ;;  %v68_v17 = vld [vmem:[#allocation5 + $0x38] sm:$0xff]  ;;  %v400_v18 = vpack.c.bf16 %v158_v13, %v157_v12  ;;  %v159_v19 = vld [vmem:[#allocation7 + $0x20] sm:$0xff]  ;;  %p496_p10 = scmp.ne.s32.totalorder %s257_s8, %s495_s9  ;;  %p501_p12 = scmp.lt.s32.totalorder %s495_s9, %s495_s9 }
  0x3b   :  { %375 = vmatprep.subr.bf16.mxu0 %v528_v0  ;;  %v160_v20 = vld [vmem:[#allocation7 + $0x28] sm:$0xff]  ;;  %v382_v21 = vpack.c.bf16 %v68_v17, %v67_v16  ;;  %v69_v22 = vld [vmem:[#allocation5 + $0x40] sm:$0xff]  ;;  %v161_v25 = vld [vmem:[#allocation7 + $0x30] sm:$0xff] }
  0x3c   :  { %398 = vmatpush3.bf16.msra.mxu1 %v397_v15  ;;  %v70_v23 = vld [vmem:[#allocation5 + $0x48] sm:$0xff]  ;;  %v403_v24 = vpack.c.bf16 %v160_v20, %v159_v19  ;;  %v162_v26 = vld [vmem:[#allocation7 + $0x38] sm:$0xff]  ;;  %v71_v28 = vld [vmem:[#allocation5 + $0x50] sm:$0xff]  ;;  %p502_p13 = por %p501_p12, %p500_p11 }
  0x3d   :  { %399 = vmatprep.subr.bf16.mxu1 %v528_v0  ;;  %v385_v27 = vpack.c.bf16 %v70_v23, %v69_v22  ;;  %v72_v29 = vld [vmem:[#allocation5 + $0x58] sm:$0xff]  ;;  %v406_v30 = vpack.c.bf16 %v162_v26, %v161_v25  ;;  %v163_v31 = vld [vmem:[#allocation7 + $0x40] sm:$0xff]  ;;  %v164_v32 = vld [vmem:[#allocation7 + $0x48] sm:$0xff] }
  0x3e   :  { %377 = vmatpush3.bf16.msra.mxu0 %v376_v7  ;;  %v388_v33 = vpack.c.bf16 %v72_v29, %v71_v28  ;;  %v73_v34 = vld [vmem:[#allocation5 + $0x60] sm:$0xff]  ;;  %v74_v35 = vld [vmem:[#allocation5 + $0x68] sm:$0xff]  ;;  %v409_v36 = vpack.c.bf16 %v164_v32, %v163_v31  ;;  %v165_v37 = vld [vmem:[#allocation7 + $0x50] sm:$0xff]  ;;  %p503_p0 = pnand %p502_p13, %p496_p10 }
  0x3f   :  { %378 = vmatprep.subr.bf16.mxu0 %v528_v0  ;;  %v166_v38 = vld [vmem:[#allocation7 + $0x58] sm:$0xff]  ;;  %v391_v39 = vpack.c.bf16 %v74_v35, %v73_v34  ;;  %v75_v40 = vld [vmem:[#allocation5 + $0x70] sm:$0xff]  ;;  %v167_v43 = vld [vmem:[#allocation7 + $0x60] sm:$0xff] }
  0x40   :  { %401 = vmatpush3.bf16.msra.mxu1 %v400_v18  ;;  %v76_v41 = vld [vmem:[#allocation5 + $0x78] sm:$0xff]  ;;  %v412_v42 = vpack.c.bf16 %v166_v38, %v165_v37  ;;  %v168_v44 = vld [vmem:[#allocation7 + $0x68] sm:$0xff]  ;;  %v169_v48 = vld [vmem:[#allocation7 + $0x70] sm:$0xff] }
  0x41   :  { %402 = vmatprep.subr.bf16.mxu1 %v528_v0  ;;  %v394_v45 = vpack.c.bf16 %v76_v41, %v75_v40  ;;  %v415_v46 = vpack.c.bf16 %v168_v44, %v167_v43  ;;  %v60_v47 = vld [vmem:[#allocation2] sm:$0xf] }
  0x42   :  { %380 = vmatpush3.bf16.msra.mxu0 %v379_v14  ;;  %v170_v49 = vld [vmem:[#allocation7 + $0x78] sm:$0xff] }
  0x43   :  { %381 = vmatprep.subr.bf16.mxu0 %v528_v0  ;;  %v418_v50 = vpack.c.bf16 %v170_v49, %v169_v48  ;;  %v266_v51 = vld [vmem:[%s640_s2] ss:$0 sm:$0xff] }
  0x44   :  { %404 = vmatpush3.bf16.msra.mxu1 %v403_v24  ;;  %v267_v56 = vld [vmem:[%s642_s4] ss:$0 sm:$0xff] }
  0x45   :  { %405 = vmatprep.subr.bf16.mxu1 %v528_v0 }
  0x46   :  { %383 = vmatpush3.bf16.msra.mxu0 %v382_v21 }
  0x47   :  { %384 = vmatprep.subr.bf16.mxu0 %v528_v0 }
  0x48   :  { %407 = vmatpush3.bf16.msra.mxu1 %v406_v30 }
  0x49   :  { %408 = vmatprep.subr.bf16.mxu1 %v528_v0 }
  0x4a   :  { %386 = vmatpush3.bf16.msra.mxu0 %v385_v27 }
  0x4b   :  { %387 = vmatprep.subr.bf16.mxu0 %v528_v0 }
  0x4c   :  { %410 = vmatpush3.bf16.msra.mxu1 %v409_v36 }
  0x4d   :  { %411 = vmatprep.subr.bf16.mxu1 %v528_v0 }
  0x4e   :  { %389 = vmatpush3.bf16.msra.mxu0 %v388_v33 }
  0x4f   :  { %390 = vmatprep.subr.bf16.mxu0 %v528_v0 }
  0x50   :  { %413 = vmatpush3.bf16.msra.mxu1 %v412_v42 }
  0x51   :  { %414 = vmatprep.subr.bf16.mxu1 %v528_v0 }
  0x52   :  { %392 = vmatpush3.bf16.msra.mxu0 %v391_v39 }
  0x53   :  { %393 = vmatprep.subr.bf16.mxu0 %v528_v0 }
  0x54   :  { %416 = vmatpush3.bf16.msra.mxu1 %v415_v46 }
  0x55   :  { %417 = vmatprep.subr.bf16.mxu1 %v528_v0 }
  0x56   :  { %395 = vmatpush3.bf16.msra.mxu0 %v394_v45 }
  0x58   :  { %419 = vmatpush3.bf16.msra.mxu1 %v418_v50 }
  0x59   :  { %335 = vmatmul.mubr.f32.vlgmr.msra.gmra.mrb[0].mxu0 %v60_v47 }
 0x12c   :  { %v150_v52 = vpop.f32.mrb[0].mxu0 }
 0x12d   :  { %v151_v53 = vadd.f32 %v266_v51, %v150_v52  ;;  %v336_v54 = vpop.f32.mrb[1].mxu0 }
 0x12f   :  { %v154_v55 = vmax.f32 %v151_v53, 0.0 }
 0x131   :  { %370 = vmatmul.mubr.f32.vlgmr.msra.gmra.mrb[0].mxu1 %v154_v55 }
 0x204   :  { %v244_v57 = vpop.f32.mrb[0].mxu1 }
 0x205   :  { %v245_v58 = vadd.f32 %v267_v56, %v244_v57  ;;  %v371_v59 = vpop.f32.mrb[1].mxu1 }
 0x207   :  { %v248_v60 = vadd.f32 %v245_v58, %v60_v47 }
 0x209   :  { %249 = vst [vmem:[#allocation8] sm:$0xf] %v248_v60 }
 0x20a   :  { %506 = shalt.err (!%p503_p0)
}
 0x20b   :  { %s507_s11 = scalar_lea.hbm %s643_s5, 64 }
 0x20c   :  { %p508_p1 = scmp.ne.s32.totalorder %s643_s5, %s507_s11  ;;  %p511_p2 = scmp.lt.u32.totalorder %s507_s11, %s643_s5 }
 0x20e   :  { %p513_p3 = pnand %p511_p2, %p508_p1 }
 0x210   :  { %516 = shalt.err (!%p513_p3)
}
 0x211   :  { %259 = dma.vmem_to_hbm [thread:$0]  %s257_s8, 64, %s643_s5, [#allocation4]  }
 0x212   :  { %521 = dma.done.wait [#allocation4], 64  }
 0x213   :  { %522 = vsyncadd [#allocation4], 4294967232 }
 0x214   :  { %263 = vsyncpa [#allocation3], 1 }
 0x215   :  { %264 = vsyncpa [#allocation6], 1 }
 0x216   :  { %265 = vsyncpa [#allocation4], 1 }

// kernel: tpu_custom_call.1
= control target key start
LH: loop header
LB: loop body
LE: loop exit
PB: predicated region body
PF: predicated region fallthrough
CT: control target
= control target key end

     0   :  { %10 = vsyncpa [#allocation3], 0  ;;  %s638_s0 = inlined_call_operand.hbm [shape: f32[4,128], index: 0, kind: input, shape index: {}]   ;;  %s639_s1 = inlined_call_operand.hbm [shape: f32[128,128], index: 1, kind: input, shape index: {}]   ;;  %s640_s2 = inlined_call_operand.vmem [shape: f32[1,128], index: 2, kind: input, shape index: {}]   ;;  %s641_s3 = inlined_call_operand.hbm [shape: f32[128,128], index: 3, kind: input, shape index: {}]   ;;  %s642_s4 = inlined_call_operand.vmem [shape: f32[1,128], index: 4, kind: input, shape index: {}]   ;;  %s643_s5 = inlined_call_operand.hbm [shape: f32[4,128], index: 5, kind: output, shape index: {}]  }
   0x1   :  { %11 = vsyncpa [#allocation6], 0 }
   0x2   :  { %12 = vsyncpa [#allocation4], 0  ;;  %s523_s18 = smov [#allocation5]   ;;  %s429_s22 = scalar_lea.hbm %s639_s1, 2048 }
   0x3   :  { %s28_s19 = sshll.u32 %s523_s18, 4  ;;  %p430_p0 = scmp.ne.s32.totalorder %s639_s1, %s429_s22  ;;  %s29_s19 = int_to_ptr.vmem [resolvable:$true] %s28_s19 }
   0x4   :  { %p433_p1 = scmp.lt.u32.totalorder %s429_s22, %s639_s1 }
   0x6   :  { %p435_p2 = pnand %p433_p1, %p430_p0 }
   0x8   :  { %438 = shalt.err (!%p435_p2)
}
   0x9   :  { %s439_s27 = scalar_lea.vmem %s29_s19, 2048  ;;  %p444_p4 = scmp.lt.s32.totalorder %s29_s19, %s29_s19 }
   0xa   :  { %p440_p3 = scmp.ne.s32.totalorder %s29_s19, %s439_s27  ;;  %p445_p5 = scmp.lt.s32.totalorder %s439_s27, %s439_s27 }
   0xc   :  { %p446_p6 = por %p445_p5, %p444_p4 }
   0xe   :  { %p447_p7 = pnand %p446_p6, %p440_p3 }
  0x10   :  { %450 = shalt.err (!%p447_p7)
}
  0x11   :  { %s524_s28 = smov 128   ;;  %s525_s29 = smov 8  }
  0x12   :  { %34 = dma.hbm_to_vmem [thread:$0]  %s639_s1, 2048, %s29_s19, [#allocation6], %s524_s28, %s524_s28, %s525_s29  }
  0x13   :  { %s526_s7 = smov [#allocation2]   ;;  %s527_s9 = smov [#allocation7]  }
  0x14   :  { %s19_s8 = sshll.u32 %s526_s7, 4  ;;  %s42_s10 = sshll.u32 %s527_s9, 4  ;;  %s20_s8 = int_to_ptr.vmem [resolvable:$true] %s19_s8  ;;  %s43_s10 = int_to_ptr.vmem [resolvable:$true] %s42_s10 }
  0x15   :  { %s451_s13 = scalar_lea.hbm %s638_s0, 64 }
  0x16   :  { %p452_p8 = scmp.ne.s32.totalorder %s638_s0, %s451_s13  ;;  %p455_p9 = scmp.lt.u32.totalorder %s451_s13, %s638_s0 }
  0x18   :  { %p457_p10 = pnand %p455_p9, %p452_p8 }
  0x1a   :  { %460 = shalt.err (!%p457_p10)
}
  0x1b   :  { %s461_s1 = scalar_lea.vmem %s20_s8, 64  ;;  %p466_p12 = scmp.lt.s32.totalorder %s20_s8, %s20_s8 }
  0x1c   :  { %p462_p11 = scmp.ne.s32.totalorder %s20_s8, %s461_s1  ;;  %p467_p13 = scmp.lt.s32.totalorder %s461_s1, %s461_s1 }
  0x1e   :  { %p468_p0 = por %p467_p13, %p466_p12 }
  0x20   :  { %p469_p1 = pnand %p468_p0, %p462_p11 }
  0x22   :  { %472 = shalt.err (!%p469_p1)
}
  0x23   :  { %22 = dma.hbm_to_vmem [thread:$0]  %s638_s0, 64, %s20_s8, [#allocation3]  }
  0x24   :  { %s473_s22 = scalar_lea.hbm %s641_s3, 2048 }
  0x25   :  { %p474_p2 = scmp.ne.s32.totalorder %s641_s3, %s473_s22  ;;  %p477_p3 = scmp.lt.u32.totalorder %s473_s22, %s641_s3 }
  0x27   :  { %p479_p4 = pnand %p477_p3, %p474_p2 }
  0x29   :  { %482 = shalt.err (!%p479_p4)
}
  0x2a   :  { %s483_s27 = scalar_lea.vmem %s43_s10, 2048  ;;  %p488_p6 = scmp.lt.s32.totalorder %s43_s10, %s43_s10 }
  0x2b   :  { %p484_p5 = scmp.ne.s32.totalorder %s43_s10, %s483_s27  ;;  %p489_p7 = scmp.lt.s32.totalorder %s483_s27, %s483_s27 }
  0x2d   :  { %p490_p8 = por %p489_p7, %p488_p6 }
  0x2f   :  { %p491_p9 = pnand %p490_p8, %p484_p5 }
  0x31   :  { %494 = shalt.err (!%p491_p9)
}
  0x32   :  { %48 = dma.hbm_to_vmem [thread:$0]  %s641_s3, 2048, %s43_s10, [#allocation6], %s524_s28, %s524_s28, %s525_s29  }
  0x33   :  { %517 = dma.done.wait [#allocation3], 64  }
  0x34   :  { %518 = vsyncadd [#allocation3], 4294967232 }
  0x35   :  { %519 = dma.done.wait [#allocation6], 4096  }
  0x36   :  { %520 = vsyncadd [#allocation6], 4294963200  ;;  %v528_v0 = vmov 0.0|0.0   ;;  %vm529_vm0 = vmmov 0   ;;  %v530_v1 = vmov 0.0   ;;  %v61_v2 = vld [vmem:[#allocation5] sm:$0xff] }
  0x37   :  { %372 = vmatprep.subr.bf16.mxu0 %v528_v0  ;;  %334 = vmatprep.mubr.msk.f32.mxu0 %vm529_vm0, %v530_v1  ;;  %v62_v3 = vld [vmem:[#allocation5 + $0x8] sm:$0xff]  ;;  %v63_v4 = vld [vmem:[#allocation5 + $0x10] sm:$0xff]  ;;  %v64_v6 = vld [vmem:[#allocation5 + $0x18] sm:$0xff]  ;;  %s531_s7 = smov [#allocation8]  }
  0x38   :  { %396 = vmatprep.subr.bf16.mxu1 %v528_v0  ;;  %369 = vmatprep.mubr.msk.f32.mxu1 %vm529_vm0, %v530_v1  ;;  %v373_v5 = vpack.c.bf16 %v62_v3, %v61_v2  ;;  %v376_v7 = vpack.c.bf16 %v64_v6, %v63_v4  ;;  %v65_v8 = vld [vmem:[#allocation5 + $0x20] sm:$0xff]  ;;  %v66_v9 = vld [vmem:[#allocation5 + $0x28] sm:$0xff]  ;;  %v157_v12 = vld [vmem:[#allocation7 + $0x10] sm:$0xff]  ;;  %s256_s8 = sshll.u32 %s531_s7, 4  ;;  %s257_s8 = int_to_ptr.vmem [resolvable:$true] %s256_s8 }
  0x39   :  { %v155_v10 = vld [vmem:[#allocation7] sm:$0xff]  ;;  %v156_v11 = vld [vmem:[#allocation7 + $0x8] sm:$0xff]  ;;  %v158_v13 = vld [vmem:[#allocation7 + $0x18] sm:$0xff]  ;;  %v379_v14 = vpack.c.bf16 %v66_v9, %v65_v8  ;;  %s495_s9 = scalar_lea.vmem %s257_s8, 64  ;;  %p500_p11 = scmp.lt.s32.totalorder %s257_s8, %s257_s8 }
  0x3a   :  { %374 = vmatpush3.bf16.msra.mxu0 %v373_v5  ;;  %v397_v15 = vpack.c.bf16 %v156_v11, %v155_v10  ;;  %v67_v16 = vld [vmem:[#allocation5 + $0x30] sm:$0xff]  ;;  %v68_v17 = vld [vmem:[#allocation5 + $0x38] sm:$0xff]  ;;  %v400_v18 = vpack.c.bf16 %v158_v13, %v157_v12  ;;  %v159_v19 = vld [vmem:[#allocation7 + $0x20] sm:$0xff]  ;;  %p496_p10 = scmp.ne.s32.totalorder %s257_s8, %s495_s9  ;;  %p501_p12 = scmp.lt.s32.totalorder %s495_s9, %s495_s9 }
  0x3b   :  { %375 = vmatprep.subr.bf16.mxu0 %v528_v0  ;;  %v160_v20 = vld [vmem:[#allocation7 + $0x28] sm:$0xff]  ;;  %v382_v21 = vpack.c.bf16 %v68_v17, %v67_v16  ;;  %v69_v22 = vld [vmem:[#allocation5 + $0x40] sm:$0xff]  ;;  %v161_v25 = vld [vmem:[#allocation7 + $0x30] sm:$0xff] }
  0x3c   :  { %398 = vmatpush3.bf16.msra.mxu1 %v397_v15  ;;  %v70_v23 = vld [vmem:[#allocation5 + $0x48] sm:$0xff]  ;;  %v403_v24 = vpack.c.bf16 %v160_v20, %v159_v19  ;;  %v162_v26 = vld [vmem:[#allocation7 + $0x38] sm:$0xff]  ;;  %v71_v28 = vld [vmem:[#allocation5 + $0x50] sm:$0xff]  ;;  %p502_p13 = por %p501_p12, %p500_p11 }
  0x3d   :  { %399 = vmatprep.subr.bf16.mxu1 %v528_v0  ;;  %v385_v27 = vpack.c.bf16 %v70_v23, %v69_v22  ;;  %v72_v29 = vld [vmem:[#allocation5 + $0x58] sm:$0xff]  ;;  %v406_v30 = vpack.c.bf16 %v162_v26, %v161_v25  ;;  %v163_v31 = vld [vmem:[#allocation7 + $0x40] sm:$0xff]  ;;  %v164_v32 = vld [vmem:[#allocation7 + $0x48] sm:$0xff] }
  0x3e   :  { %377 = vmatpush3.bf16.msra.mxu0 %v376_v7  ;;  %v388_v33 = vpack.c.bf16 %v72_v29, %v71_v28  ;;  %v73_v34 = vld [vmem:[#allocation5 + $0x60] sm:$0xff]  ;;  %v74_v35 = vld [vmem:[#allocation5 + $0x68] sm:$0xff]  ;;  %v409_v36 = vpack.c.bf16 %v164_v32, %v163_v31  ;;  %v165_v37 = vld [vmem:[#allocation7 + $0x50] sm:$0xff]  ;;  %p503_p0 = pnand %p502_p13, %p496_p10 }
  0x3f   :  { %378 = vmatprep.subr.bf16.mxu0 %v528_v0  ;;  %v166_v38 = vld [vmem:[#allocation7 + $0x58] sm:$0xff]  ;;  %v391_v39 = vpack.c.bf16 %v74_v35, %v73_v34  ;;  %v75_v40 = vld [vmem:[#allocation5 + $0x70] sm:$0xff]  ;;  %v167_v43 = vld [vmem:[#allocation7 + $0x60] sm:$0xff] }
  0x40   :  { %401 = vmatpush3.bf16.msra.mxu1 %v400_v18  ;;  %v76_v41 = vld [vmem:[#allocation5 + $0x78] sm:$0xff]  ;;  %v412_v42 = vpack.c.bf16 %v166_v38, %v165_v37  ;;  %v168_v44 = vld [vmem:[#allocation7 + $0x68] sm:$0xff]  ;;  %v169_v48 = vld [vmem:[#allocation7 + $0x70] sm:$0xff] }
  0x41   :  { %402 = vmatprep.subr.bf16.mxu1 %v528_v0  ;;  %v394_v45 = vpack.c.bf16 %v76_v41, %v75_v40  ;;  %v415_v46 = vpack.c.bf16 %v168_v44, %v167_v43  ;;  %v60_v47 = vld [vmem:[#allocation2] sm:$0xf] }
  0x42   :  { %380 = vmatpush3.bf16.msra.mxu0 %v379_v14  ;;  %v170_v49 = vld [vmem:[#allocation7 + $0x78] sm:$0xff] }
  0x43   :  { %381 = vmatprep.subr.bf16.mxu0 %v528_v0  ;;  %v418_v50 = vpack.c.bf16 %v170_v49, %v169_v48  ;;  %v266_v51 = vld [vmem:[%s640_s2] ss:$0 sm:$0xff] }
  0x44   :  { %404 = vmatpush3.bf16.msra.mxu1 %v403_v24  ;;  %v267_v56 = vld [vmem:[%s642_s4] ss:$0 sm:$0xff] }
  0x45   :  { %405 = vmatprep.subr.bf16.mxu1 %v528_v0 }
  0x46   :  { %383 = vmatpush3.bf16.msra.mxu0 %v382_v21 }
  0x47   :  { %384 = vmatprep.subr.bf16.mxu0 %v528_v0 }
  0x48   :  { %407 = vmatpush3.bf16.msra.mxu1 %v406_v30 }
  0x49   :  { %408 = vmatprep.subr.bf16.mxu1 %v528_v0 }
  0x4a   :  { %386 = vmatpush3.bf16.msra.mxu0 %v385_v27 }
  0x4b   :  { %387 = vmatprep.subr.bf16.mxu0 %v528_v0 }
  0x4c   :  { %410 = vmatpush3.bf16.msra.mxu1 %v409_v36 }
  0x4d   :  { %411 = vmatprep.subr.bf16.mxu1 %v528_v0 }
  0x4e   :  { %389 = vmatpush3.bf16.msra.mxu0 %v388_v33 }
  0x4f   :  { %390 = vmatprep.subr.bf16.mxu0 %v528_v0 }
  0x50   :  { %413 = vmatpush3.bf16.msra.mxu1 %v412_v42 }
  0x51   :  { %414 = vmatprep.subr.bf16.mxu1 %v528_v0 }
  0x52   :  { %392 = vmatpush3.bf16.msra.mxu0 %v391_v39 }
  0x53   :  { %393 = vmatprep.subr.bf16.mxu0 %v528_v0 }
  0x54   :  { %416 = vmatpush3.bf16.msra.mxu1 %v415_v46 }
  0x55   :  { %417 = vmatprep.subr.bf16.mxu1 %v528_v0 }
  0x56   :  { %395 = vmatpush3.bf16.msra.mxu0 %v394_v45 }
  0x58   :  { %419 = vmatpush3.bf16.msra.mxu1 %v418_v50 }
  0x59   :  { %335 = vmatmul.mubr.f32.vlgmr.msra.gmra.mrb[0].mxu0 %v60_v47 }
 0x12c   :  { %v150_v52 = vpop.f32.mrb[0].mxu0 }
 0x12d   :  { %v151_v53 = vadd.f32 %v266_v51, %v150_v52  ;;  %v336_v54 = vpop.f32.mrb[1].mxu0 }
 0x12f   :  { %v154_v55 = vmax.f32 %v151_v53, 0.0 }
 0x131   :  { %370 = vmatmul.mubr.f32.vlgmr.msra.gmra.mrb[0].mxu1 %v154_v55 }
 0x204   :  { %v244_v57 = vpop.f32.mrb[0].mxu1 }
 0x205   :  { %v245_v58 = vadd.f32 %v267_v56, %v244_v57  ;;  %v371_v59 = vpop.f32.mrb[1].mxu1 }
 0x207   :  { %v248_v60 = vadd.f32 %v245_v58, %v60_v47 }
 0x209   :  { %249 = vst [vmem:[#allocation8] sm:$0xf] %v248_v60 }
 0x20a   :  { %506 = shalt.err (!%p503_p0)
}
 0x20b   :  { %s507_s11 = scalar_lea.hbm %s643_s5, 64 }
 0x20c   :  { %p508_p1 = scmp.ne.s32.totalorder %s643_s5, %s507_s11  ;;  %p511_p2 = scmp.lt.u32.totalorder %s507_s11, %s643_s5 }
 0x20e   :  { %p513_p3 = pnand %p511_p2, %p508_p1 }
 0x210   :  { %516 = shalt.err (!%p513_p3)
}
 0x211   :  { %259 = dma.vmem_to_hbm [thread:$0]  %s257_s8, 64, %s643_s5, [#allocation4]  }
 0x212   :  { %521 = dma.done.wait [#allocation4], 64  }
 0x213   :  { %522 = vsyncadd [#allocation4], 4294967232 }
 0x214   :  { %263 = vsyncpa [#allocation3], 1 }
 0x215   :  { %264 = vsyncpa [#allocation6], 1 }
 0x216   :  { %265 = vsyncpa [#allocation4], 1 }

</bundles_post_ra>
